<compile_context>
chip_gen: v6e
topology: v6e:2x2x1
jax: 0.10.0
libtpu: 0.0.40
codegen_flags: <defaults>
</compile_context>

<pallas_src>
import functools

import jax
import jax.numpy as jnp
from jax.experimental import pallas as pl
from jax.experimental.pallas import tpu as pltpu


_MXU_REDUCE_MIN_CPAD = 512   # offload class-axis sums to the MXU at/above this width


def _alsr_kernel(x_ref, idx_ref, out_ref, *, eps, alpha, num_classes, batch):
    x = x_ref[...].astype(jnp.float32)                 # (tb, c_pad); pad cols are 0
    tb, c_pad = x.shape
    c = num_classes
    n_pad = c_pad - c                                   # static

    idx = idx_ref[...]                                  # (tb, 2) int32: [3*pid, vid]
    pid3 = idx[:, 0:1]
    vid = idx[:, 1:2]

    col = jax.lax.broadcasted_iota(jnp.int32, (tb, c_pad), 1)
    col_rel = col - pid3                                 # window-relative column index
    # Single unsigned compare: negative col_rel bitcasts to a huge uint32 (>= 3).
    mask3 = pltpu.bitcast(col_rel, jnp.uint32) < jnp.uint32(3)
    maskv = col_rel == vid                               # the exact (pid, vid) column

    # Row-wise class-axis reduction.  At large C_pad the adds before the cross-lane
    # step would land on the saturated VALU slot, so push them onto the idle MXU.
    if c_pad >= _MXU_REDUCE_MIN_CPAD:
        ones_mx = jnp.ones((c_pad, 128), jnp.float32)

        def rowsum(t):
            return jnp.dot(t, ones_mx, preferred_element_type=jnp.float32)[:, 0:1]
    else:
        def rowsum(t):
            return jnp.sum(t, axis=1, keepdims=True)

    # --- softmax statistics over the class axis --------------------------------
    # m = max over the zero-padded row (>= real row max -> still stable); the pad
    # columns' contribution to sum(z)/sum(e) is removed with two (tb,1) corrections
    # instead of full-tile masking (pad z == -m, pad e == exp(-m)).
    m = jnp.max(x, axis=1, keepdims=True)                # (tb, 1)
    z = x - m
    e = jnp.exp(z)                                       # single EUP pass

    z_sum = rowsum(z)
    s = rowsum(e)
    if n_pad:
        z_sum = z_sum + float(n_pad) * m
        s = s - float(n_pad) * jnp.exp(-m)
    inv_s = pl.reciprocal(s)                             # exact; probs = e * inv_s (implicit)
    lse = jnp.log(s)                                     # log_probs = z - lse (implicit)

    # --- masked reductions (probs / log_probs / targets never materialized) ----
    z3 = rowsum(jnp.where(mask3, z, 0.0))                # sum z over the 3 pid columns
    e3 = rowsum(jnp.where(mask3, e, 0.0))                # sum e over the 3 pid columns
    zt = rowsum(jnp.where(maskv, z, 0.0))                # z at the exact target column
    et = jnp.exp(zt)                                     # = e[target] (single column)

    S = z_sum - float(c) * lse                           # sum_c log_probs (real columns)
    S3 = z3 - 3.0 * lse                                  # sum over the 3 pid columns
    lpt = zt - lse                                       # log_prob at pid*3 + vid

    ep1 = alpha * (1.0 - e3 * inv_s)                     # alpha * (1 - sum probs[pid window])
    ep2 = alpha * (1.0 - et * inv_s)                     # alpha * (1 - probs[pid*3 + vid])
    base = ep1 * (1.0 / float(c - 3))

    # sum_c targets * log_probs with targets = (1-eps)*t + eps/C and
    # t = base off-window, 0.5*ep2 on the pid window, 1-ep1-ep2 at the exact column.
    t_dot_lp = (base * S
                + (0.5 * ep2 - base) * S3
                + (1.0 - ep1 - 1.5 * ep2) * lpt)
    row_loss = -((1.0 - eps) * t_dot_lp + (eps / float(c)) * S)    # (tb, 1)

    if batch % tb != 0:
        # Ragged last tile: zero padded (garbage) rows.  Static branch -> no cost
        # when tb divides B (e.g. the demo below).
        row = pl.program_id(0) * tb + jax.lax.broadcasted_iota(jnp.int32, (tb, 1), 0)
        row_loss = jnp.where(row < batch, row_loss, 0.0)

    # One partial sum per tile, splatted over a dense (8, 128) block so the writeback
    # is a full unmasked vector store; the wrapper reads [:, 0, 0].
    tile_sum = jnp.sum(row_loss, axis=0, keepdims=True)            # (1, 1)
    out_ref[...] = jnp.broadcast_to(tile_sum[:, :, None], (1, 8, 128))


def _tpu_vmem_capacity_bytes():
    """Best-effort physical VMEM query; returns None when unknown."""
    try:
        info = pltpu.get_tpu_info()
    except Exception:
        return None
    for attr in ("vmem_capacity_bytes", "vmem_bytes", "vmem_size_bytes"):
        val = getattr(info, attr, None)
        if val:
            return int(val)
    return None


def alsr_loss(inputs, pids, vids, *, num_classes, eps=0.1, alpha=0.2,
              label_smooth=True, block_rows=2048, logits_buffers=2):
    """Pallas implementation of ALSRLoss.forward(inputs, (pids, vids)).

    `inputs` is consumed in its native dtype (feed bf16 on mem-bound v5e/v6e to halve
    the dominant logits DMA stream; the kernel upcasts to f32 on load).  The batch
    tile is sized from a VMEM budget and split into >= 2 grid tiles when B >= 16 so
    v7x's two TensorCores are both used.  Set `logits_buffers=3` only if xprof shows
    the logits DMA exposed at narrow class counts (C_pad <= 512).
    """
    eff_eps = float(eps) if label_smooth else 0.0
    B, C = inputs.shape
    assert C == num_classes
    assert num_classes > 3, "ALSRLoss requires num_classes > 3 (ep1 / (C - 3))"

    # Lane padding: keep class-axis work on full 128-lane vregs.  Padded columns are
    # zeros; the kernel removes their contribution with per-row scalar corrections.
    c_pad = ((C + 127) // 128) * 128
    if c_pad != C:
        inputs = jnp.pad(inputs, ((0, 0), (0, c_pad - C)))

    # Packed per-row scalars [3*pid, vid]: one small DMA descriptor per grid step.
    idx = jnp.concatenate(
        [(pids.astype(jnp.int32) * 3).reshape(B, 1),
         vids.astype(jnp.int32).reshape(B, 1)], axis=1)

    # ---- generation-aware tile sizing & VMEM limit -----------------------------
    itemsize = jnp.dtype(inputs.dtype).itemsize
    n_buf = max(2, int(logits_buffers))
    vmem_cap = _tpu_vmem_capacity_bytes()        # 128 MiB v5e/v6e, 64 MiB v7x (per TC)
    if vmem_cap:
        vmem_limit = min((vmem_cap * 3) // 4, 100 << 20)   # ~96 MiB v5e/v6e, ~48 MiB v7x
        sizing_bytes = vmem_limit
    else:
        vmem_limit = None                        # keep the compiler default limit
        sizing_bytes = 24 << 20                  # conservative sizing assumption

    # Per-row VMEM ~ n-buffered logits tile + ~24 B/elem of live f32/int32 temporaries.
    bytes_per_row = c_pad * (n_buf * itemsize + 24) + 64
    budget = int(sizing_bytes * 0.65)

    if B < 16:
        tb = B                                   # single tile == full batch extent
    else:
        tb = max(8, min(budget // bytes_per_row, block_rows, 2048) // 8 * 8)
        # Guarantee >= 2 grid tiles so both v7x TensorCores get work ("parallel" axis);
        # the extra grid step is ~0.35 us on single-TC v5e/v6e.
        tb = min(tb, max(8, (B // 2) // 8 * 8))
    num_tiles = pl.cdiv(B, tb)

    kernel = functools.partial(_alsr_kernel, eps=eff_eps, alpha=float(alpha),
                               num_classes=num_classes, batch=B)

    logits_spec_kwargs = {}
    if n_buf > 2:
        # TODO(synk): enable only after xprof shows the logits DMA exposed (small C);
        # costs one extra logits buffer of VMEM per additional depth.
        logits_spec_kwargs["pipeline_mode"] = pl.Buffered(n_buf)
    logits_spec = pl.BlockSpec((tb, c_pad), lambda i: (i, 0), **logits_spec_kwargs)

    cp_kwargs = dict(dimension_semantics=("parallel",))
    if vmem_limit is not None:
        cp_kwargs["vmem_limit_bytes"] = int(vmem_limit)

    cost = pl.CostEstimate(
        flops=16 * B * c_pad,
        transcendentals=B * c_pad + 3 * B,
        bytes_accessed=B * c_pad * itemsize + B * 8 + num_tiles * 8 * 128 * 4,
    )

    partial_sums = pl.pallas_call(
        kernel,
        out_shape=jax.ShapeDtypeStruct((num_tiles, 8, 128), jnp.float32),
        grid_spec=pltpu.PrefetchScalarGridSpec(
            num_scalar_prefetch=0,
            grid=(num_tiles,),
            in_specs=[
                logits_spec,                                   # logits tile
                pl.BlockSpec((tb, 2), lambda i: (i, 0)),       # packed [3*pid, vid]
            ],
            out_specs=pl.BlockSpec((1, 8, 128), lambda i: (i, 0, 0)),
        ),
        compiler_params=pltpu.CompilerParams(**cp_kwargs),
        cost_estimate=cost,
    )(inputs, idx)

    return jnp.sum(partial_sums[:, 0, 0]) / B


def _alsr_loss_ref(inputs, pids, vids, *, num_classes, eps=0.1, alpha=0.2,
                   label_smooth=True):
    """Pure-JAX reference mirroring the (intended) PyTorch semantics."""
    eff_eps = eps if label_smooth else 0.0
    B, C = inputs.shape
    log_probs = jax.nn.log_softmax(inputs.astype(jnp.float32), axis=1)
    probs = jnp.exp(log_probs)
    pid3 = (pids * 3).astype(jnp.int32)[:, None]
    vid = vids.astype(jnp.int32)[:, None]
    col = jnp.arange(C, dtype=jnp.int32)[None, :]
    mask3 = (col >= pid3) & (col < pid3 + 3)
    maskv = col == (pid3 + vid)
    ep1 = alpha * (1.0 - jnp.sum(jnp.where(mask3, probs, 0.0), axis=1, keepdims=True))
    ep2 = alpha * (1.0 - jnp.sum(jnp.where(maskv, probs, 0.0), axis=1, keepdims=True))
    t = jnp.where(maskv, 1.0 - ep1 - ep2,
                  jnp.where(mask3, 0.5 * ep2, ep1 / (num_classes - 3)))
    t = (1.0 - eff_eps) * t + eff_eps / num_classes
    return jnp.sum(-t * log_probs) / B


if __name__ == "__main__":
    key = jax.random.PRNGKey(0)
    k1, k2, k3 = jax.random.split(key, 3)

    batch = 8
    num_pids = 16
    num_vids = 3
    num_classes = num_pids * num_vids   # C = 48 (lane-padded to 128 inside the wrapper)

    inputs = jax.random.normal(k1, (batch, num_classes), dtype=jnp.float32)
    pids = jax.random.randint(k2, (batch,), 0, num_pids, dtype=jnp.int32)
    vids = jax.random.randint(k3, (batch,), 0, num_vids, dtype=jnp.int32)

    loss = alsr_loss(inputs, pids, vids, num_classes=num_classes,
                     eps=0.1, alpha=0.2, label_smooth=True)
    loss = jax.block_until_ready(loss)

    ref = _alsr_loss_ref(inputs, pids, vids, num_classes=num_classes,
                         eps=0.1, alpha=0.2, label_smooth=True)
    assert jnp.isfinite(loss)
    assert jnp.allclose(loss, ref, rtol=1e-4, atol=1e-5), (loss, ref)

    print("KERNEL_OK")
</pallas_src>

<mosaic_0001>
module attributes {stable_mosaic.version = 11 : i64} {
  func.func @_alsr_kernel(%arg0: i32, %arg1: memref<8x128xf32, #tpu.memory_space<vmem>>, %arg2: memref<8x2xi32, #tpu.memory_space<vmem>>, %arg3: memref<1x8x128xf32, #tpu.memory_space<vmem>>) attributes {dimension_semantics = [#tpu.dimension_semantics<parallel>], iteration_bounds = array<i64: 1>, scalar_prefetch = 0 : i64, scratch_operands = 0 : i64, tpu.core_type = #tpu.core_type<tc>, window_params = [{transform_indices = @transform_0, window_bounds = array<i64: 8, 128>}, {transform_indices = @transform_1, window_bounds = array<i64: 8, 2>}, {transform_indices = @transform_2, window_bounds = array<i64: 1, 8, 128>}]} {
    %c0 = arith.constant 0 : index
    %c0_0 = arith.constant 0 : index
    %0 = vector.load %arg1[%c0, %c0_0] : memref<8x128xf32, #tpu.memory_space<vmem>>, vector<8x128xf32>
    %c0_1 = arith.constant 0 : index
    %c0_2 = arith.constant 0 : index
    %1 = vector.load %arg2[%c0_1, %c0_2] : memref<8x2xi32, #tpu.memory_space<vmem>>, vector<8x2xi32>
    %2 = vector.extract_strided_slice %1 {offsets = [0, 0], sizes = [8, 1], strides = [1, 1]} : vector<8x2xi32> to vector<8x1xi32>
    %3 = vector.extract_strided_slice %1 {offsets = [0, 1], sizes = [8, 1], strides = [1, 1]} : vector<8x2xi32> to vector<8x1xi32>
    %4 = tpu.iota {dimensions = array<i32: 1>} : vector<8x128xi32>
    %5 = vector.broadcast %2 : vector<8x1xi32> to vector<8x128xi32>
    %6 = arith.subi %4, %5 : vector<8x128xi32>
    %7 = tpu.bitcast %6 : vector<8x128xi32> -> vector<8x128xi32>
    %c3_i32 = arith.constant 3 : i32
    %8 = vector.broadcast %c3_i32 : i32 to vector<8x128xi32>
    %9 = arith.cmpi ult, %7, %8 : vector<8x128xi32>
    %10 = vector.broadcast %3 : vector<8x1xi32> to vector<8x128xi32>
    %11 = arith.cmpi eq, %6, %10 : vector<8x128xi32>
    %cst = arith.constant dense<0xFF800000> : vector<8xf32>
    %12 = vector.multi_reduction <maximumf>, %0, %cst [1] : vector<8x128xf32> to vector<8xf32>
    %13 = vector.shape_cast %12 : vector<8xf32> to vector<8x1xf32>
    %14 = vector.broadcast %13 : vector<8x1xf32> to vector<8x128xf32>
    %15 = arith.subf %0, %14 : vector<8x128xf32>
    %16 = math.exp %15 : vector<8x128xf32>
    %cst_3 = arith.constant dense<0.000000e+00> : vector<8xf32>
    %17 = vector.multi_reduction <add>, %15, %cst_3 [1] : vector<8x128xf32> to vector<8xf32>
    %18 = vector.shape_cast %17 : vector<8xf32> to vector<8x1xf32>
    %cst_4 = arith.constant dense<0.000000e+00> : vector<8xf32>
    %19 = vector.multi_reduction <add>, %16, %cst_4 [1] : vector<8x128xf32> to vector<8xf32>
    %20 = vector.shape_cast %19 : vector<8xf32> to vector<8x1xf32>
    %cst_5 = arith.constant 8.000000e+01 : f32
    %21 = vector.broadcast %cst_5 : f32 to vector<8x1xf32>
    %22 = arith.mulf %21, %13 : vector<8x1xf32>
    %23 = arith.addf %18, %22 : vector<8x1xf32>
    %cst_6 = arith.constant 0.000000e+00 : f32
    %24 = vector.broadcast %cst_6 : f32 to vector<8x1xf32>
    %25 = arith.subf %24, %13 : vector<8x1xf32>
    %26 = math.exp %25 : vector<8x1xf32>
    %cst_7 = arith.constant 8.000000e+01 : f32
    %27 = vector.broadcast %cst_7 : f32 to vector<8x1xf32>
    %28 = arith.mulf %27, %26 : vector<8x1xf32>
    %29 = arith.subf %20, %28 : vector<8x1xf32>
    %30 = tpu.reciprocal %29 : vector<8x1xf32> -> vector<8x1xf32>
    %31 = math.log %29 : vector<8x1xf32>
    %cst_8 = arith.constant 0.000000e+00 : f32
    %32 = vector.broadcast %cst_8 : f32 to vector<8x128xf32>
    %33 = arith.select %9, %15, %32 : vector<8x128xi1>, vector<8x128xf32>
    %cst_9 = arith.constant dense<0.000000e+00> : vector<8xf32>
    %34 = vector.multi_reduction <add>, %33, %cst_9 [1] : vector<8x128xf32> to vector<8xf32>
    %35 = vector.shape_cast %34 : vector<8xf32> to vector<8x1xf32>
    %cst_10 = arith.constant 0.000000e+00 : f32
    %36 = vector.broadcast %cst_10 : f32 to vector<8x128xf32>
    %37 = arith.select %9, %16, %36 : vector<8x128xi1>, vector<8x128xf32>
    %cst_11 = arith.constant dense<0.000000e+00> : vector<8xf32>
    %38 = vector.multi_reduction <add>, %37, %cst_11 [1] : vector<8x128xf32> to vector<8xf32>
    %39 = vector.shape_cast %38 : vector<8xf32> to vector<8x1xf32>
    %cst_12 = arith.constant 0.000000e+00 : f32
    %40 = vector.broadcast %cst_12 : f32 to vector<8x128xf32>
    %41 = arith.select %11, %15, %40 : vector<8x128xi1>, vector<8x128xf32>
    %cst_13 = arith.constant dense<0.000000e+00> : vector<8xf32>
    %42 = vector.multi_reduction <add>, %41, %cst_13 [1] : vector<8x128xf32> to vector<8xf32>
    %43 = vector.shape_cast %42 : vector<8xf32> to vector<8x1xf32>
    %44 = math.exp %43 : vector<8x1xf32>
    %cst_14 = arith.constant 4.800000e+01 : f32
    %45 = vector.broadcast %cst_14 : f32 to vector<8x1xf32>
    %46 = arith.mulf %45, %31 : vector<8x1xf32>
    %47 = arith.subf %23, %46 : vector<8x1xf32>
    %cst_15 = arith.constant 3.000000e+00 : f32
    %48 = vector.broadcast %cst_15 : f32 to vector<8x1xf32>
    %49 = arith.mulf %48, %31 : vector<8x1xf32>
    %50 = arith.subf %35, %49 : vector<8x1xf32>
    %51 = arith.subf %43, %31 : vector<8x1xf32>
    %52 = arith.mulf %39, %30 : vector<8x1xf32>
    %cst_16 = arith.constant 1.000000e+00 : f32
    %53 = vector.broadcast %cst_16 : f32 to vector<8x1xf32>
    %54 = arith.subf %53, %52 : vector<8x1xf32>
    %cst_17 = arith.constant 2.000000e-01 : f32
    %55 = vector.broadcast %cst_17 : f32 to vector<8x1xf32>
    %56 = arith.mulf %55, %54 : vector<8x1xf32>
    %57 = arith.mulf %44, %30 : vector<8x1xf32>
    %cst_18 = arith.constant 1.000000e+00 : f32
    %58 = vector.broadcast %cst_18 : f32 to vector<8x1xf32>
    %59 = arith.subf %58, %57 : vector<8x1xf32>
    %cst_19 = arith.constant 2.000000e-01 : f32
    %60 = vector.broadcast %cst_19 : f32 to vector<8x1xf32>
    %61 = arith.mulf %60, %59 : vector<8x1xf32>
    %cst_20 = arith.constant 0.0222222228 : f32
    %62 = vector.broadcast %cst_20 : f32 to vector<8x1xf32>
    %63 = arith.mulf %56, %62 : vector<8x1xf32>
    %64 = arith.mulf %63, %47 : vector<8x1xf32>
    %cst_21 = arith.constant 5.000000e-01 : f32
    %65 = vector.broadcast %cst_21 : f32 to vector<8x1xf32>
    %66 = arith.mulf %65, %61 : vector<8x1xf32>
    %67 = arith.subf %66, %63 : vector<8x1xf32>
    %68 = arith.mulf %67, %50 : vector<8x1xf32>
    %69 = arith.addf %64, %68 : vector<8x1xf32>
    %cst_22 = arith.constant 1.000000e+00 : f32
    %70 = vector.broadcast %cst_22 : f32 to vector<8x1xf32>
    %71 = arith.subf %70, %56 : vector<8x1xf32>
    %cst_23 = arith.constant 1.500000e+00 : f32
    %72 = vector.broadcast %cst_23 : f32 to vector<8x1xf32>
    %73 = arith.mulf %72, %61 : vector<8x1xf32>
    %74 = arith.subf %71, %73 : vector<8x1xf32>
    %75 = arith.mulf %74, %51 : vector<8x1xf32>
    %76 = arith.addf %69, %75 : vector<8x1xf32>
    %cst_24 = arith.constant 0.899999976 : f32
    %77 = vector.broadcast %cst_24 : f32 to vector<8x1xf32>
    %78 = arith.mulf %77, %76 : vector<8x1xf32>
    %cst_25 = arith.constant 0.00208333344 : f32
    %79 = vector.broadcast %cst_25 : f32 to vector<8x1xf32>
    %80 = arith.mulf %79, %47 : vector<8x1xf32>
    %81 = arith.addf %78, %80 : vector<8x1xf32>
    %cst_26 = arith.constant 0.000000e+00 : f32
    %82 = vector.broadcast %cst_26 : f32 to vector<8x1xf32>
    %83 = arith.subf %82, %81 : vector<8x1xf32>
    %cst_27 = arith.constant dense<0.000000e+00> : vector<1xf32>
    %84 = vector.multi_reduction <add>, %83, %cst_27 [0] : vector<8x1xf32> to vector<1xf32>
    %85 = vector.shape_cast %84 : vector<1xf32> to vector<1x1xf32>
    %86 = vector.shape_cast %85 : vector<1x1xf32> to vector<1x1x1xf32>
    %87 = vector.shape_cast %86 : vector<1x1x1xf32> to vector<1x1x1xf32>
    %88 = vector.broadcast %87 : vector<1x1x1xf32> to vector<1x8x128xf32>
    %c0_28 = arith.constant 0 : index
    %c0_29 = arith.constant 0 : index
    %c0_30 = arith.constant 0 : index
    %89 = vector.load %arg3[%c0_28, %c0_29, %c0_30] : memref<1x8x128xf32, #tpu.memory_space<vmem>>, vector<1x8x128xf32>
    tpu.vector_store %arg3[%c0_28, %c0_29, %c0_30], %88 {strides = array<i32>} : memref<1x8x128xf32, #tpu.memory_space<vmem>>, vector<1x8x128xf32>,
    return
  }
  func.func @transform_0(%arg0: i32) -> (i32, i32) {
    %c0_i32 = arith.constant 0 : i32
    %c0_i32_0 = arith.constant 0 : i32
    return %arg0, %c0_i32 : i32, i32
  }
  func.func @transform_1(%arg0: i32) -> (i32, i32) {
    %c0_i32 = arith.constant 0 : i32
    %c0_i32_0 = arith.constant 0 : i32
    return %arg0, %c0_i32 : i32, i32
  }
  func.func @transform_2(%arg0: i32) -> (i32, i32, i32) {
    %c0_i32 = arith.constant 0 : i32
    %c0_i32_0 = arith.constant 0 : i32
    %c0_i32_1 = arith.constant 0 : i32
    return %arg0, %c0_i32, %c0_i32_0 : i32, i32, i32
  }
}

</mosaic_0001>

<bundles_post_ra>
// kernel: tpu_custom_call.1
= control target key start
LH: loop header
LB: loop body
LE: loop exit
PB: predicated region body
PF: predicated region fallthrough
CT: control target
= control target key end

     0   :  { %s167_s0 = inlined_call_operand.vmem [shape: f32[8,128], index: 0, kind: input, shape index: {}]   ;;  %s168_s1 = inlined_call_operand.vmem [shape: s32[8,2], index: 1, kind: input, shape index: {}]   ;;  %s169_s2 = inlined_call_operand.hbm [shape: f32[1,8,128], index: 2, kind: output, shape index: {}]  }
   0x1   :  { %v12_v0 = vld [vmem:[%s167_s0] sm:$0xff] }
   0x2   :  { %7 = vsyncpa [#allocation3], 0  ;;  %25 = vmax.xlane.f32.xlu0 %v12_v0  ;;  %v13_v1 = vld [vmem:[%s168_s1] sm:$0xff]  ;;  %v140_v2 = vmov 1   ;;  %v141_v3 = vmov 0   ;;  %v14_v7 = vlaneseq  ;;  %s142_s0 = smov [#allocation2]  }
   0x3   :  { %106 = vset.pattern.permute.xlu1 %v140_v2  ;;  %105 = vset.pattern.permute.xlu0 %v141_v3  ;;  %s94_s1 = sshll.u32 %s142_s0, 4  ;;  %s95_s1 = int_to_ptr.vmem [resolvable:$true] %s94_s1 }
   0x4   :  { %22 = vperm.xlu1 %106, %v13_v1   ;;  %v15_v8 = vand.u32 127, %v14_v7  ;;  %s118_s13 = scalar_lea.vmem %s95_s1, 128  ;;  %p123_p1 = scmp.lt.s32.totalorder %s95_s1, %s95_s1 }
   0x5   :  { %p119_p0 = scmp.ne.s32.totalorder %s95_s1, %s118_s13  ;;  %p124_p2 = scmp.lt.s32.totalorder %s118_s13, %s118_s13 }
   0x7   :  { %p125_p3 = por %p124_p2, %p123_p1 }
   0x9   :  { %p126_p4 = pnand %p125_p3, %p119_p0 }
  0x18   :  { %17 = vperm.xlu0 %105, %v13_v1  }
  0x1c   :  { %107 = vset.pattern.permute.xlu0 %v140_v2 }
  0x7f   :  { %v23_v11 = vpop.permute.xlu1 %22 }
  0x8b   :  { %v26_v4 = vpop.xlane.xlu0 %25 }
  0x8c   :  { %v27_v5 = vsub.f32 %v12_v0, %v26_v4  ;;  %v36_v16 = vsub.f32 0.0, %v26_v4  ;;  %v34_v35 = vmul.f32 80.0, %v26_v4 }
  0x8e   :  { %v28_v6 = vmul.f32 1.442695, %v27_v5  ;;  %30 = vadd.xlane.f32.xlu0 %v27_v5  ;;  %v37_v17 = vmul.f32 1.442695, %v36_v16 }
  0x90   :  { %108 = vpow2.f32 %v28_v6 }
  0x91   :  { %110 = vpow2.f32 %v37_v17 }
  0x93   :  { %v18_v9 = vpop.permute.xlu0 %17 }
  0x94   :  { %v19_v10 = vsub.s32 %v15_v8, %v18_v9 }
  0x96   :  { %vm24_vm0 = vcmp.eq.s32.totalorder %v19_v10, %v23_v11  ;;  %vm20_vm1 = vcmp.lt.u32.totalorder %v19_v10, 3 }
  0x97   :  { %v50_v13 = vsel %vm24_vm0, %v27_v5, 0.0  ;;  %v44_v15 = vsel %vm20_vm1, %v27_v5, 0.0 }
  0x9d   :  { %v109_v12 = vpop.eup %108 }
  0x9e   :  { %32 = vadd.xlane.f32.xlu1 %v109_v12  ;;  %v47_v14 = vsel %vm20_vm1, %v109_v12, 0.0  ;;  %v111_v18 = vpop.eup %110 }
  0x9f   :  { %v39_v19 = vmul.f32 80.0, %v111_v18 }
  0xa2   :  { %51 = vadd.xlane.f32.xlu1 %v50_v13 }
  0xa6   :  { %48 = vadd.xlane.f32.xlu1 %v47_v14 }
  0xaa   :  { %45 = vadd.xlane.f32.xlu1 %v44_v15 }
 0x117   :  { %v31_v32 = vpop.xlane.xlu0 %30 }
 0x118   :  { %v35_v39 = vadd.f32 %v34_v35, %v31_v32 }
 0x127   :  { %v33_v20 = vpop.xlane.xlu1 %32 }
 0x128   :  { %v40_v21 = vsub.f32 %v33_v20, %v39_v19 }
 0x12a   :  { %112 = vrcp.f32 %v40_v21 }
 0x12b   :  { %v52_v22 = vpop.xlane.xlu1 %51  ;;  %114 = vlog2.f32 %v40_v21 }
 0x12c   :  { %v53_v23 = vmul.f32 1.442695, %v52_v22 }
 0x12e   :  { %116 = vpow2.f32 %v53_v23 }
 0x12f   :  { %v49_v25 = vpop.xlane.xlu1 %48 }
 0x133   :  { %v46_v44 = vpop.xlane.xlu1 %45 }
 0x137   :  { %v113_v24 = vpop.eup %112 }
 0x138   :  { %v60_v26 = vmul.f32 %v113_v24, %v49_v25  ;;  %v115_v27 = vpop.eup %114 }
 0x139   :  { %v43_v30 = vmul.f32 0.6931472, %v115_v27 }
 0x13a   :  { %v61_v28 = vsub.f32 1.0, %v60_v26 }
 0x13b   :  { %v117_v29 = vpop.eup %116  ;;  %v55_v36 = vmul.f32 48.0, %v43_v30  ;;  %v57_v38 = vmul.f32 3.0, %v43_v30  ;;  %v59_v49 = vsub.f32 %v52_v22, %v43_v30 }
 0x13c   :  { %v63_v31 = vmul.f32 %v117_v29, %v113_v24  ;;  %v62_v34 = vmul.f32 0.2, %v61_v28 }
 0x13d   :  { %v56_v45 = vsub.f32 %v35_v39, %v55_v36  ;;  %v58_v48 = vsub.f32 %v46_v44, %v57_v38 }
 0x13e   :  { %v64_v33 = vsub.f32 1.0, %v63_v31  ;;  %v66_v41 = vmul.f32 0.022222223, %v62_v34  ;;  %v72_v42 = vsub.f32 1.0, %v62_v34 }
 0x13f   :  { %v78_v55 = vmul.f32 0.0020833334, %v56_v45 }
 0x140   :  { %v65_v37 = vmul.f32 0.2, %v64_v33  ;;  %v67_v50 = vmul.f32 %v66_v41, %v56_v45 }
 0x142   :  { %v73_v40 = vmul.f32 1.5, %v65_v37  ;;  %v68_v43 = vmul.f32 0.5, %v65_v37 }
 0x144   :  { %v74_v46 = vsub.f32 %v72_v42, %v73_v40  ;;  %v69_v47 = vsub.f32 %v68_v43, %v66_v41 }
 0x146   :  { %v70_v51 = vmul.f32 %v69_v47, %v58_v48  ;;  %v75_v52 = vmul.f32 %v74_v46, %v59_v49 }
 0x148   :  { %v71_v53 = vadd.f32 %v70_v51, %v67_v50 }
 0x14a   :  { %v76_v54 = vadd.f32 %v75_v52, %v71_v53 }
 0x14c   :  { %v77_v56 = vmul.f32 0.9, %v76_v54 }
 0x14e   :  { %v79_v57 = vadd.f32 %v78_v55, %v77_v56 }
 0x150   :  { %v80_v58 = vsub.f32 0.0, %v79_v57 }
 0x152   :  { %v81_v59 = vrot.slane %v80_v58, 4 }
 0x154   :  { %v82_v60 = vadd.f32 %v81_v59, %v80_v58 }
 0x156   :  { %v83_v61 = vrot.slane %v82_v60, 2 }
 0x158   :  { %v84_v62 = vadd.f32 %v83_v61, %v82_v60 }
 0x15a   :  { %v85_v63 = vrot.slane %v84_v62, 1 }
 0x15c   :  { %v86_v0 = vadd.f32 %v85_v63, %v84_v62 }
 0x15e   :  { %87 = vst [vmem:[#allocation2] sm:$0xff] %v86_v0 }
 0x15f   :  { %129 = shalt.err (!%p126_p4)
}
 0x160   :  { %97 = dma.vmem_to_hbm [thread:$0]  %s95_s1, 128, %s169_s2, [#allocation3]  }
 0x161   :  { %138 = dma.done.wait [#allocation3], 128  }
 0x162   :  { %139 = vsyncadd [#allocation3], 4294967168 }
 0x163   :  { %101 = vsyncpa [#allocation3], 1 }

</bundles_post_ra>
